<compile_context>
chip_gen: v7x
topology: tpu7x:2x2x1
jax: 0.10.0
libtpu: 0.0.40
codegen_flags: <defaults>
</compile_context>

<pallas_src>
import jax
import jax.numpy as jnp
from jax.experimental import pallas as pl
from jax.experimental.pallas import tpu as pltpu


def _cdiv(a, b):
    return -(-a // b)


def _round_up(n, m):
    return _cdiv(n, m) * m


def _simple_nn_kernel(x_ref, w1_ref, b1_ref, w2_ref, b2_ref, o_ref):
    # x_ref : (tbp, p*D)   packed rows: p original batch rows per 128-lane packed row
    # w1_ref: (p*D, p*H)   block-diagonal fc1 weight (VMEM-resident)
    # b1_ref: (1, p*H)     tiled fc1 bias
    # w2_ref: (p*H, p)     block-diagonal fc2 weight
    # b2_ref: (1, 1)       fc2 bias
    # o_ref : (tbp, p)     per packed-row group of p sigmoid outputs
    h = jnp.dot(x_ref[...], w1_ref[...], preferred_element_type=jnp.float32)
    h = jnp.maximum(h + b1_ref[...], 0.0)                                   # bias + ReLU (VPU)
    z = jnp.dot(h, w2_ref[...], preferred_element_type=jnp.float32) + b2_ref[...]
    o_ref[...] = jax.nn.sigmoid(z)                                          # exp -> EUP


def simple_nn_forward(x, w1, b1, w2, b2, *, block_rows=8192):
    """Fused SimpleNN forward (PyTorch parameter layout).

    x  : (B, D) float32
    w1 : (H, D) float32   -- fc1.weight (H = 10)
    b1 : (H,)   float32   -- fc1.bias
    w2 : (1, H) float32   -- fc2.weight
    b2 : (1,)   float32   -- fc2.bias
    returns (B, 1) float32 = sigmoid(relu(x @ w1.T + b1) @ w2.T + b2)
    """
    B, D = x.shape
    H = w1.shape[0]
    dt = x.dtype

    # ---- lane packing factor: fold p original rows into one 128-lane packed row ----
    if D <= 128 and 128 % D == 0 and B % (128 // D) == 0:
        p = 128 // D
    else:
        p = 1  # TODO(synk): D not a power-of-two divisor of 128 keeps the lane-padded layout.

    Bp = B // p
    xp = x.reshape(Bp, p * D)  # contiguous row-major reshape: no data movement

    # ---- tiny one-off parameter transforms to the packed kernel layout ----
    w1t = jnp.asarray(w1, dt).T                              # (D, H)
    eye_p = jnp.eye(p, dtype=dt)
    # W1bd[g*D+d, k*H+h] = w1t[d, h] if g == k else 0
    w1bd = jnp.einsum("gk,dh->gdkh", eye_p, w1t).reshape(p * D, p * H)
    b1t = jnp.tile(jnp.asarray(b1, dt).reshape(1, H), (1, p))               # (1, p*H)
    # W2bd[k*H+h, g] = w2[h] if k == g else 0
    w2bd = jnp.einsum("kg,h->khg", eye_p, jnp.asarray(w2, dt).reshape(H)).reshape(p * H, p)
    b2r = jnp.asarray(b2, dt).reshape(1, 1)

    # ---- batch tile selection (in packed rows) ----
    # Validate/round block_rows so tiles always satisfy the (8, 128) layout rules.
    block_rows = max(1024, _round_up(int(block_rows), 1024))
    tbp_max = block_rows // p                                # multiple of 8 for any valid p
    if Bp > tbp_max:
        tbp = tbp_max                                        # many tiles, ragged last tile OK
    elif Bp >= 2 * 512:
        tbp = _round_up(_cdiv(Bp, 2), 8)                     # >= 2 tiles so both v7x TCs work
    else:
        tbp = Bp                                             # single tile == full array
    grid = (_cdiv(Bp, tbp),)

    out = pl.pallas_call(
        _simple_nn_kernel,
        out_shape=jax.ShapeDtypeStruct((Bp, p), jnp.float32),
        grid_spec=pltpu.PrefetchScalarGridSpec(
            num_scalar_prefetch=0,
            grid=grid,
            in_specs=[
                pl.BlockSpec((tbp, p * D), lambda i: (i, 0)),     # x: streamed, double-buffered
                pl.BlockSpec((p * D, p * H), lambda i: (0, 0)),   # w1 (block-diag): VMEM-resident
                pl.BlockSpec((1, p * H), lambda i: (0, 0)),       # b1: VMEM-resident
                pl.BlockSpec((p * H, p), lambda i: (0, 0)),       # w2 (block-diag): VMEM-resident
                pl.BlockSpec((1, 1), lambda i: (0, 0)),           # b2: VMEM-resident
            ],
            out_specs=pl.BlockSpec((tbp, p), lambda i: (i, 0)),
        ),
        compiler_params=pltpu.CompilerParams(
            dimension_semantics=("parallel",),
            vmem_limit_bytes=32 * 1024 * 1024,
        ),
    )(xp, w1bd, b1t, w2bd, b2r)

    # (Bp, p) row-major == original batch order; tiny output, reshape is cheap.
    return out.reshape(B, 1)


def init_params(key, input_size, hidden=10):
    """Deterministic init mimicking PyTorch nn.Linear (uniform +/- 1/sqrt(fan_in))."""
    k1, k2, k3, k4 = jax.random.split(key, 4)
    lim1 = 1.0 / jnp.sqrt(jnp.float32(input_size))
    lim2 = 1.0 / jnp.sqrt(jnp.float32(hidden))
    w1 = jax.random.uniform(k1, (hidden, input_size), jnp.float32, -lim1, lim1)  # fc1.weight
    b1 = jax.random.uniform(k2, (hidden,), jnp.float32, -lim1, lim1)             # fc1.bias
    w2 = jax.random.uniform(k3, (1, hidden), jnp.float32, -lim2, lim2)           # fc2.weight
    b2 = jax.random.uniform(k4, (1,), jnp.float32, -lim2, lim2)                  # fc2.bias
    return w1, b1, w2, b2


def _reference(x, w1, b1, w2, b2):
    h = jnp.maximum(x @ w1.T + b1, 0.0)
    return jax.nn.sigmoid(h @ w2.T + b2)


if __name__ == "__main__":
    key = jax.random.PRNGKey(0)
    kx, kp, kx2, kx3 = jax.random.split(key, 4)

    input_size = 32
    w1, b1, w2, b2 = init_params(kp, input_size)

    fwd = jax.jit(simple_nn_forward, static_argnames=("block_rows",))

    # Small-shape check consistent with the module (batch=8, input_size=32): packed path,
    # single full-array tile.
    batch = 8
    x = jax.random.normal(kx, (batch, input_size), dtype=jnp.float32)
    out = jax.block_until_ready(fwd(x, w1, b1, w2, b2))
    ref = _reference(x, w1, b1, w2, b2)
    assert out.shape == (batch, 1)
    assert jnp.allclose(out, ref, atol=1e-5, rtol=1e-5), float(jnp.max(jnp.abs(out - ref)))

    # Multi-tile grid with a ragged last tile on the packed path (no wrapper-side padding).
    batch2 = 4100
    x2 = jax.random.normal(kx2, (batch2, input_size), dtype=jnp.float32)
    out2 = jax.block_until_ready(fwd(x2, w1, b1, w2, b2, block_rows=1024))
    ref2 = _reference(x2, w1, b1, w2, b2)
    assert out2.shape == (batch2, 1)
    assert jnp.allclose(out2, ref2, atol=1e-5, rtol=1e-5), float(jnp.max(jnp.abs(out2 - ref2)))

    # Batch not divisible by the packing factor -> unpacked (p=1) fallback, still unpadded.
    batch3 = 1302
    x3 = jax.random.normal(kx3, (batch3, input_size), dtype=jnp.float32)
    out3 = jax.block_until_ready(fwd(x3, w1, b1, w2, b2, block_rows=1024))
    ref3 = _reference(x3, w1, b1, w2, b2)
    assert out3.shape == (batch3, 1)
    assert jnp.allclose(out3, ref3, atol=1e-5, rtol=1e-5), float(jnp.max(jnp.abs(out3 - ref3)))

    print("KERNEL_OK")
</pallas_src>

<mosaic_0001>
module attributes {stable_mosaic.version = 11 : i64} {
  func.func @_simple_nn_kernel(%arg0: i32, %arg1: memref<2x128xf32, #tpu.memory_space<vmem>>, %arg2: memref<128x40xf32, #tpu.memory_space<vmem>>, %arg3: memref<1x40xf32, #tpu.memory_space<vmem>>, %arg4: memref<40x4xf32, #tpu.memory_space<vmem>>, %arg5: memref<1x1xf32, #tpu.memory_space<vmem>>, %arg6: memref<2x4xf32, #tpu.memory_space<vmem>>) attributes {dimension_semantics = [#tpu.dimension_semantics<parallel>], iteration_bounds = array<i64: 1>, scalar_prefetch = 0 : i64, scratch_operands = 0 : i64, tpu.core_type = #tpu.core_type<tc>, window_params = [{transform_indices = @transform_0, window_bounds = array<i64: 2, 128>}, {pipeline_mode = #tpu.pipeline_mode<synchronous>, transform_indices = @transform_1, window_bounds = array<i64: 128, 40>}, {pipeline_mode = #tpu.pipeline_mode<synchronous>, transform_indices = @transform_2, window_bounds = array<i64: 1, 40>}, {pipeline_mode = #tpu.pipeline_mode<synchronous>, transform_indices = @transform_3, window_bounds = array<i64: 40, 4>}, {pipeline_mode = #tpu.pipeline_mode<synchronous>, transform_indices = @transform_4, window_bounds = array<i64: 1, 1>}, {transform_indices = @transform_5, window_bounds = array<i64: 2, 4>}]} {
    %c0 = arith.constant 0 : index
    %c0_0 = arith.constant 0 : index
    %0 = vector.load %arg1[%c0, %c0_0] : memref<2x128xf32, #tpu.memory_space<vmem>>, vector<2x128xf32>
    %c0_1 = arith.constant 0 : index
    %c0_2 = arith.constant 0 : index
    %1 = vector.load %arg2[%c0_1, %c0_2] : memref<128x40xf32, #tpu.memory_space<vmem>>, vector<128x40xf32>
    %cst = arith.constant dense<0.000000e+00> : vector<2x40xf32>
    %2 = tpu.matmul %0, %1, %cst {dimension_numbers = #tpu.dot_dimension_numbers<[1], [0], [0], [1], [0, 0, 1, 1], [], []>} : vector<2x128xf32>, vector<128x40xf32>, vector<2x40xf32> -> vector<2x40xf32>
    %c0_3 = arith.constant 0 : index
    %c0_4 = arith.constant 0 : index
    %3 = vector.load %arg3[%c0_3, %c0_4] : memref<1x40xf32, #tpu.memory_space<vmem>>, vector<1x40xf32>
    %4 = vector.broadcast %3 : vector<1x40xf32> to vector<2x40xf32>
    %5 = arith.addf %2, %4 : vector<2x40xf32>
    %cst_5 = arith.constant 0.000000e+00 : f32
    %6 = vector.broadcast %cst_5 : f32 to vector<2x40xf32>
    %7 = arith.maximumf %5, %6 : vector<2x40xf32>
    %c0_6 = arith.constant 0 : index
    %c0_7 = arith.constant 0 : index
    %8 = vector.load %arg4[%c0_6, %c0_7] : memref<40x4xf32, #tpu.memory_space<vmem>>, vector<40x4xf32>
    %cst_8 = arith.constant dense<0.000000e+00> : vector<2x4xf32>
    %9 = tpu.matmul %7, %8, %cst_8 {dimension_numbers = #tpu.dot_dimension_numbers<[1], [0], [0], [1], [0, 0, 1, 1], [], []>} : vector<2x40xf32>, vector<40x4xf32>, vector<2x4xf32> -> vector<2x4xf32>
    %c0_9 = arith.constant 0 : index
    %c0_10 = arith.constant 0 : index
    %10 = vector.load %arg5[%c0_9, %c0_10] : memref<1x1xf32, #tpu.memory_space<vmem>>, vector<1x1xf32>
    %11 = vector.broadcast %10 : vector<1x1xf32> to vector<2x4xf32>
    %12 = arith.addf %9, %11 : vector<2x4xf32>
    %13 = arith.negf %12 : vector<2x4xf32>
    %14 = math.exp %13 : vector<2x4xf32>
    %cst_11 = arith.constant 1.000000e+00 : f32
    %15 = vector.broadcast %cst_11 : f32 to vector<2x4xf32>
    %16 = arith.addf %15, %14 : vector<2x4xf32>
    %17 = arith.divf %15, %16 : vector<2x4xf32>
    %c0_12 = arith.constant 0 : index
    %c0_13 = arith.constant 0 : index
    %18 = vector.load %arg6[%c0_12, %c0_13] : memref<2x4xf32, #tpu.memory_space<vmem>>, vector<2x4xf32>
    tpu.vector_store %arg6[%c0_12, %c0_13], %17 {strides = array<i32>} : memref<2x4xf32, #tpu.memory_space<vmem>>, vector<2x4xf32>,
    return
  }
  func.func @transform_0(%arg0: i32) -> (i32, i32) {
    %c0_i32 = arith.constant 0 : i32
    %c0_i32_0 = arith.constant 0 : i32
    return %arg0, %c0_i32 : i32, i32
  }
  func.func @transform_1(%arg0: i32) -> (i32, i32) {
    %c0_i32 = arith.constant 0 : i32
    %c0_i32_0 = arith.constant 0 : i32
    %c0_i32_1 = arith.constant 0 : i32
    return %c0_i32, %c0_i32_0 : i32, i32
  }
  func.func @transform_2(%arg0: i32) -> (i32, i32) {
    %c0_i32 = arith.constant 0 : i32
    %c0_i32_0 = arith.constant 0 : i32
    %c0_i32_1 = arith.constant 0 : i32
    return %c0_i32, %c0_i32_0 : i32, i32
  }
  func.func @transform_3(%arg0: i32) -> (i32, i32) {
    %c0_i32 = arith.constant 0 : i32
    %c0_i32_0 = arith.constant 0 : i32
    %c0_i32_1 = arith.constant 0 : i32
    return %c0_i32, %c0_i32_0 : i32, i32
  }
  func.func @transform_4(%arg0: i32) -> (i32, i32) {
    %c0_i32 = arith.constant 0 : i32
    %c0_i32_0 = arith.constant 0 : i32
    %c0_i32_1 = arith.constant 0 : i32
    return %c0_i32, %c0_i32_0 : i32, i32
  }
  func.func @transform_5(%arg0: i32) -> (i32, i32) {
    %c0_i32 = arith.constant 0 : i32
    %c0_i32_0 = arith.constant 0 : i32
    return %arg0, %c0_i32 : i32, i32
  }
}

</mosaic_0001>

<bundles_post_ra>
// kernel: simple_nn_forward.1
= control target key start
LH: loop header
LB: loop body
LE: loop exit
PB: predicated region body
PF: predicated region fallthrough
CT: control target
= control target key end

     0   :  { %v332_v0 = vmov 0.0|0.0   ;;  %vm333_vm0 = vmmov 0   ;;  %v334_v4 = vmov 0.0   ;;  %v335_v34 = vmov 0   ;;  %s441_s1 = inlined_call_operand.vmem [shape: f32[128,40], index: 1, kind: input, shape index: {}]   ;;  %s442_s3 = inlined_call_operand.vmem [shape: f32[40,4], index: 3, kind: input, shape index: {}]   ;;  %s443_s0 = inlined_call_operand.vmem [shape: f32[2,128], index: 0, kind: input, shape index: {}]   ;;  %s444_s4 = inlined_call_operand.<no memory space> [shape: f32[1,1], index: 4, kind: input, shape index: {}]   ;;  %s445_s2 = inlined_call_operand.vmem [shape: f32[1,40], index: 2, kind: input, shape index: {}]   ;;  %s446_s5 = inlined_call_operand.vmem [shape: f32[2,4], index: 5, kind: output, shape index: {}]  }
   0x1   :  { %293 = vmatprep.subr.bf16.mxu0 %v332_v0  ;;  %v23_v1 = vld [vmem:[%s441_s1] sm:$0xff]  ;;  %v24_v2 = vld [vmem:[%s441_s1 + $0x8] sm:$0xff]  ;;  %v25_v3 = vld [vmem:[%s441_s1 + $0x10] sm:$0xff]  ;;  %277 = vmatprep.mubr.msk.f32.mxu0 %vm333_vm0, %v334_v4  ;;  %v10_v35 = vstv %s444_s4  ;;  %vm132_vm1 = vcmask 326656   ;;  %vm212_vm2 = vcmask 25600  }
   0x2   :  { %v294_v5 = vpack.c.bf16 %v24_v2, %v23_v1  ;;  %v26_v6 = vld [vmem:[%s441_s1 + $0x18] sm:$0xff]  ;;  %317 = vmatprep.subr.bf16.mxu1 %v332_v0  ;;  %290 = vmatprep.mubr.msk.f32.mxu1 %vm333_vm0, %v334_v4  ;;  %v27_v8 = vld [vmem:[%s441_s1 + $0x20] sm:$0xff]  ;;  %v28_v9 = vld [vmem:[%s441_s1 + $0x28] sm:$0xff]  ;;  %11 = vst [vmem:[#allocation2] sm:$0x1] %v10_v35 }
   0x3   :  { %v297_v7 = vpack.c.bf16 %v26_v6, %v25_v3  ;;  %v117_v10 = vld [vmem:[%s442_s3] sm:$0xff]  ;;  %v118_v11 = vld [vmem:[%s442_s3 + $0x8] sm:$0xff]  ;;  %v300_v12 = vpack.c.bf16 %v28_v9, %v27_v8  ;;  %v29_v14 = vld [vmem:[%s441_s1 + $0x30] sm:$0xff]  ;;  %327 = vset.pattern.permute.xlu0 %v335_v34 }
   0x4   :  { %295 = vmatpush3.bf16.msra.mxu0 %v294_v5  ;;  %v318_v13 = vpack.c.bf16 %v118_v11, %v117_v10  ;;  %v30_v15 = vld [vmem:[%s441_s1 + $0x38] sm:$0xff]  ;;  %v31_v17 = vld [vmem:[%s441_s1 + $0x40] sm:$0xff]  ;;  %v32_v18 = vld [vmem:[%s441_s1 + $0x48] sm:$0xff] }
   0x5   :  { %296 = vmatprep.subr.bf16.mxu0 %v332_v0  ;;  %v303_v16 = vpack.c.bf16 %v30_v15, %v29_v14  ;;  %v306_v19 = vpack.c.bf16 %v32_v18, %v31_v17  ;;  %v33_v20 = vld [vmem:[%s441_s1 + $0x50] sm:$0xff]  ;;  %v34_v21 = vld [vmem:[%s441_s1 + $0x58] sm:$0xff]  ;;  %v35_v23 = vld [vmem:[%s441_s1 + $0x60] sm:$0xff] }
   0x6   :  { %319 = vmatpush3.bf16.msra.mxu1 %v318_v13  ;;  %v309_v22 = vpack.c.bf16 %v34_v21, %v33_v20  ;;  %v36_v24 = vld [vmem:[%s441_s1 + $0x68] sm:$0xff]  ;;  %v37_v26 = vld [vmem:[%s441_s1 + $0x70] sm:$0xff]  ;;  %v38_v27 = vld [vmem:[%s441_s1 + $0x78] sm:$0xff] }
   0x7   :  { %320 = vmatprep.subr.bf16.mxu1 %v332_v0  ;;  %v312_v25 = vpack.c.bf16 %v36_v24, %v35_v23  ;;  %v315_v28 = vpack.c.bf16 %v38_v27, %v37_v26  ;;  %v22_v29 = vld [vmem:[%s443_s0] sm:$0x3]  ;;  %v119_v30 = vld [vmem:[%s442_s3 + $0x10] sm:$0xff]  ;;  %v120_v31 = vld [vmem:[%s442_s3 + $0x18] sm:$0xff] }
   0x8   :  { %298 = vmatpush3.bf16.msra.mxu0 %v297_v7  ;;  %v321_v32 = vpack.c.bf16 %v120_v31, %v119_v30  ;;  %v121_v33 = vld [vmem:[%s442_s3 + $0x20] sm:$0xff] }
   0x9   :  { %299 = vmatprep.subr.bf16.mxu0 %v332_v0  ;;  %v219_v36 = vld [vmem:[#allocation2] ss:$0 sm:$0xff] }
   0xa   :  { %322 = vmatpush3.bf16.msra.mxu1 %v321_v32  ;;  %129 = vperm.xlu0 %327, %v219_v36   ;;  %v218_v37 = vld [vmem:[%s445_s2] ss:$0 sm:$0xff] }
   0xb   :  { %288 = vmatprep.subr.mxu1 %v334_v4 }
   0xc   :  { %301 = vmatpush3.bf16.msra.mxu0 %v300_v12 }
   0xd   :  { %302 = vmatprep.subr.bf16.mxu0 %v332_v0 }
   0xe   :  { %289 = vmatpush3.msra.mxu1 %v121_v33 }
  0x10   :  { %304 = vmatpush3.bf16.msra.mxu0 %v303_v16 }
  0x11   :  { %305 = vmatprep.subr.bf16.mxu0 %v332_v0 }
  0x14   :  { %307 = vmatpush3.bf16.msra.mxu0 %v306_v19 }
  0x15   :  { %308 = vmatprep.subr.bf16.mxu0 %v332_v0 }
  0x18   :  { %310 = vmatpush3.bf16.msra.mxu0 %v309_v22 }
  0x19   :  { %311 = vmatprep.subr.bf16.mxu0 %v332_v0 }
  0x1c   :  { %313 = vmatpush3.bf16.msra.mxu0 %v312_v25 }
  0x1d   :  { %314 = vmatprep.subr.bf16.mxu0 %v332_v0 }
  0x20   :  { %316 = vmatpush3.bf16.msra.mxu0 %v315_v28 }
  0x23   :  { %278 = vmatmul.mubr.f32.vlgmr.msra.gmra.mrb[0].mxu0 %v22_v29 }
  0x89   :  { %v130_v42 = vpop.permute.xlu0 %129 }
  0xf6   :  { %v112_v38 = vpop.f32.mrb[0].mxu0 }
  0xf7   :  { %v113_v39 = vadd.f32 %v218_v37, %v112_v38  ;;  %v279_v40 = vpop.f32.mrb[1].mxu0 }
  0xf9   :  { %v116_v41 = vmax.f32 %v113_v39, 0.0 }
  0xfb   :  { %291 = vmatmul.mubr.msk.f32.vlgmr.msra.gmra.mrb[0].mxu1 %vm132_vm1, %v116_v41 }
 0x1ce   :  { %v202_v43 = vpop.f32.mrb[0].mxu1 }
 0x1cf   :  { %v203_v44 = vadd.f32 %v202_v43, %v130_v42  ;;  %v292_v45 = vpop.f32.mrb[1].mxu1 }
 0x1d1   :  { %v221_v46 = vmul.f32 -1.442695, %v203_v44 }
 0x1d3   :  { %328 = vpow2.f32 %v221_v46 }
 0x1dd   :  { %v329_v47 = vpop.eup %328 }
 0x1de   :  { %v209_v48 = vadd.f32 1.0, %v329_v47 }
 0x1e0   :  { %330 = vrcp.f32 %v209_v48 }
 0x1ea   :  { %v331_v49 = vpop.eup %330 }
 0x1eb   :  { %213 = vst.msk [vmem:[%s446_s5] sm:$0x3] %vm212_vm2, %v331_v49 }

</bundles_post_ra>
